<compile_context>
chip_gen: v7x
topology: tpu7x:2x2x1
jax: 0.10.0
libtpu: 0.0.40
codegen_flags: <defaults>
</compile_context>

<pallas_src>
import functools

import jax
import jax.numpy as jnp
import numpy as np
from jax.experimental import pallas as pl
from jax.experimental.pallas import tpu as pltpu

EPS = 1e-5
NMASK = 13          # cutoff channels 8,10,...,32
NMASK_PAD = 16      # mask channels padded to a sublane multiple
NPARAM = 11         # packed per-channel vectors: g0 b0 c1 g1 be1 c2 g2 be2 c3 gn bn


# --------------------------------- kernel ---------------------------------

def for_next_block_kernel(x_ref, cad_ref, pv_ref, w_ref, out_ref, *, s_real):
    G, Cp, Sp = out_ref.shape
    Mp = pv_ref.shape[0] - Cp

    pv = pv_ref[...]                                   # (Cp+Mp, NPARAM)
    W = w_ref[...]                                     # (Cp, 3*Cp+Mp)

    # static slices of the packed per-channel parameter table
    g0f, b0f = pv[:Cp, 0:1], pv[:Cp, 1:2]              # IN#0 feature channels
    g0m, b0m = pv[Cp:Cp + Mp, 0:1], pv[Cp:Cp + Mp, 1:2]   # IN#0 mask channels
    c1 = pv[:Cp, 2:3]
    g1, be1 = pv[:Cp, 3:4], pv[:Cp, 4:5]
    c2 = pv[:Cp, 5:6]
    g2, be2 = pv[:Cp, 6:7], pv[:Cp, 7:8]
    c3 = pv[:Cp, 8:9]
    gn, bn = pv[:Cp, 9:10], pv[:Cp, 10:11]

    # static slices of the packed weight slab
    w1f = W[:, 0:Cp]                                   # (Cp, Cp)   feat part of conv #0
    w1m = W[:, Cp:Cp + Mp]                             # (Cp, Mp)   mask part of conv #0
    w2 = W[:, Cp + Mp:2 * Cp + Mp]                     # (Cp, Cp)
    w3 = W[:, 2 * Cp + Mp:3 * Cp + Mp]                 # (Cp, Cp)

    # cutoff column vector 8,10,...  (padded rows have zero gamma/weights)
    cut = (jax.lax.broadcasted_iota(jnp.int32, (Mp, 1), 0).astype(jnp.float32)
           * 2.0 + 8.0)

    inv_s = 1.0 / float(s_real)
    if Sp == s_real:
        valid = None
    else:
        lane = jax.lax.broadcasted_iota(jnp.int32, (1, Sp), 1)
        valid = (lane < s_real).astype(jnp.float32)    # lane-validity for padded S

    def vmean(v):
        vv = v if valid is None else v * valid
        return jnp.sum(vv, axis=-1, keepdims=True) * inv_s

    def inorm(v, g, b):
        # one-pass fused instance norm over the spatial (lane) axis, per channel.
        # inputs here are already conv outputs of normalized data -> well scaled.
        mu = vmean(v)
        var = jnp.maximum(vmean(v * v) - mu * mu, 0.0)
        scale = g * jax.lax.rsqrt(var + EPS)
        return v * scale + (b - mu * scale)

    def elu(v):
        return jnp.where(v > 0, v, jnp.exp(jnp.minimum(v, 0.0)) - 1.0)

    for g in range(G):                                  # static unroll, G is small
        x = x_ref[g].astype(jnp.float32)                # (Cp, Sp) feature channels
        cad = cad_ref[g]                                # (1, Sp)  f32
        mask = (cad <= cut).astype(jnp.float32)         # (Mp, Sp) built in-kernel

        # ---- InstanceNorm #0, folded into the first 1x1 conv --------------
        # feature channels: pivot-centred one-pass stats (avoids E[x^2]-mu^2
        # cancellation on raw, arbitrarily-scaled features)
        pivot = x[:, 0:1]
        d = x - pivot
        mu_d = vmean(d)
        var_f = jnp.maximum(vmean(d * d) - mu_d * mu_d, 0.0)
        s_f = g0f * jax.lax.rsqrt(var_f + EPS)          # (Cp, 1)
        t_f = b0f - (pivot + mu_d) * s_f

        # mask channels: exact stats for 0/1 values (var = p*(1-p))
        p_m = vmean(mask)
        var_m = jnp.maximum(p_m * (1.0 - p_m), 0.0)
        s_m = g0m * jax.lax.rsqrt(var_m + EPS)          # (Mp, 1)
        t_m = b0m - p_m * s_m

        # y0 = w1 @ IN0([x; mask]) + c1  ==  (w1 .* scale) @ [x; mask] + bias
        bias1 = (jnp.sum(w1f * t_f.T, axis=1, keepdims=True)
                 + jnp.sum(w1m * t_m.T, axis=1, keepdims=True) + c1)
        y0 = (jnp.dot(w1f * s_f.T, x, preferred_element_type=jnp.float32)
              + jnp.dot(w1m * s_m.T, mask, preferred_element_type=jnp.float32)
              + bias1)                                   # (Cp, Sp)

        # ---- residual block: IN -> ELU -> conv -> IN -> ELU -> conv -------
        # TODO(synk): Dropout(p=0.1) is identity here (eval semantics).
        h = elu(inorm(y0, g1, be1))
        h = jnp.dot(w2, h, preferred_element_type=jnp.float32) + c2
        h = elu(inorm(h, g2, be2))
        h = jnp.dot(w3, h, preferred_element_type=jnp.float32) + c3
        y = h + y0

        # ---- nad: IN -> ELU -> Dropout(p=0) --------------------------------
        out_ref[g] = elu(inorm(y, gn, bn)).astype(out_ref.dtype)


# --------------------------------- wrapper ---------------------------------

def _round_up(a, m):
    return (a + m - 1) // m * m


def _vmem_limit_bytes():
    # Generation-aware VMEM limit (~80% of physical): ~51 MiB on v7x,
    # ~102 MiB on v5e/v6e.  Conservative fallback if the query is unavailable.
    try:
        cap = int(pltpu.get_tpu_info().vmem_capacity_bytes)
        if cap <= 0:
            raise ValueError
    except Exception:
        return 48 * 1024 * 1024
    return int(cap * 0.8)


def _pack_params(params, C, Cp, Mp):
    """Pack the 11 per-channel vectors into one (Cp+Mp, NPARAM) table."""
    def col(vec_feat, vec_mask=None):
        v = jnp.zeros((Cp + Mp,), jnp.float32)
        v = v.at[:C].set(jnp.asarray(vec_feat, jnp.float32).reshape(-1))
        if vec_mask is not None:
            v = v.at[Cp:Cp + NMASK].set(
                jnp.asarray(vec_mask, jnp.float32).reshape(-1))
        return v

    g0 = jnp.asarray(params['g0'], jnp.float32)          # (C+13,) feat then mask
    b0 = jnp.asarray(params['b0'], jnp.float32)
    cols = [
        col(g0[:C], g0[C:]),
        col(b0[:C], b0[C:]),
        col(params['c1']),
        col(params['g1']),
        col(params['be1']),
        col(params['c2']),
        col(params['g2']),
        col(params['be2']),
        col(params['c3']),
        col(params['gn']),
        col(params['bn']),
    ]
    return jnp.stack(cols, axis=1)                        # (Cp+Mp, NPARAM)


def _pack_weights(params, C, Cp, Mp):
    """Pack w1(feat) | w1(mask) | w2 | w3 into one (Cp, 3*Cp+Mp) slab."""
    w1 = jnp.asarray(params['w1'], jnp.float32)           # (C, C+13)
    w2 = jnp.asarray(params['w2'], jnp.float32)           # (C, C)
    w3 = jnp.asarray(params['w3'], jnp.float32)           # (C, C)
    w1f = jnp.zeros((Cp, Cp), jnp.float32).at[:C, :C].set(w1[:, :C])
    w1m = jnp.zeros((Cp, Mp), jnp.float32).at[:C, :NMASK].set(w1[:, C:])
    w2p = jnp.zeros((Cp, Cp), jnp.float32).at[:C, :C].set(w2)
    w3p = jnp.zeros((Cp, Cp), jnp.float32).at[:C, :C].set(w3)
    return jnp.concatenate([w1f, w1m, w2p, w3p], axis=1)


def for_next_block(feat, cad, params, *, batch_block=1, feat_dtype=jnp.float32):
    """feat: (N, L, L, C), cad: (N, L, L) -> (N, L, L, C) float32."""
    N, L1, L2, C = feat.shape
    S = L1 * L2
    Sp = _round_up(S, 128)                 # lane-dense spatial axis
    Cp = _round_up(C, 8)                   # sublane-aligned channel axis
    Mp = NMASK_PAD
    G = int(batch_block)
    if N % G:
        raise ValueError(f"batch_block={G} must divide N={N}")

    # channels-first, spatial flattened onto the lane axis, zero-padded
    x = jnp.transpose(feat, (0, 3, 1, 2)).reshape(N, C, S).astype(jnp.float32)
    x = jnp.pad(x, ((0, 0), (0, Cp - C), (0, Sp - S))).astype(feat_dtype)

    # cad is streamed as a single f32 row per batch (masks are built in-kernel;
    # kept f32 so the <=cutoff compares are bit-exact even when feat is bf16)
    cadr = jnp.pad(cad.reshape(N, 1, S).astype(jnp.float32),
                   ((0, 0), (0, 0), (0, Sp - S)))

    pvec = _pack_params(params, C, Cp, Mp)                 # (Cp+Mp, 11)
    wslab = _pack_weights(params, C, Cp, Mp)               # (Cp, 3*Cp+Mp)

    kern = functools.partial(for_next_block_kernel, s_real=S)

    out = pl.pallas_call(
        kern,
        out_shape=jax.ShapeDtypeStruct((N, Cp, Sp), jnp.float32),
        grid=(N // G,),
        in_specs=[
            pl.BlockSpec((G, Cp, Sp), lambda n: (n, 0, 0)),
            pl.BlockSpec((G, 1, Sp), lambda n: (n, 0, 0)),
            pl.BlockSpec((Cp + Mp, NPARAM), lambda n: (0, 0)),
            pl.BlockSpec((Cp, 3 * Cp + Mp), lambda n: (0, 0)),
        ],
        out_specs=pl.BlockSpec((G, Cp, Sp), lambda n: (n, 0, 0)),
        compiler_params=pltpu.CompilerParams(
            dimension_semantics=("parallel",),
            vmem_limit_bytes=_vmem_limit_bytes()),
    )(x, cadr, pvec, wslab)

    out = out[:, :C, :S].reshape(N, C, L1, L2)
    return jnp.transpose(out, (0, 2, 3, 1))


# --------------------- deterministic synthetic parameters ---------------------

def init_params(key, C):
    Cin = C + NMASK
    ks = jax.random.split(key, 14)

    def rnd(k, shape, scale):
        return scale * jax.random.normal(k, shape, dtype=jnp.float32)

    return dict(
        g0=1.0 + rnd(ks[0], (Cin,), 0.1),    # ins gamma
        b0=rnd(ks[1], (Cin,), 0.1),          # ins beta
        w1=rnd(ks[2], (C, Cin), 0.3),        # conv weight (Cout, Cin)
        c1=rnd(ks[3], (C,), 0.1),
        g1=1.0 + rnd(ks[4], (C,), 0.1),      # block IN #1
        be1=rnd(ks[5], (C,), 0.1),
        w2=rnd(ks[6], (C, C), 0.3),          # block conv #1
        c2=rnd(ks[7], (C,), 0.1),
        g2=1.0 + rnd(ks[8], (C,), 0.1),      # block IN #2
        be2=rnd(ks[9], (C,), 0.1),
        w3=rnd(ks[10], (C, C), 0.3),         # block conv #2
        c3=rnd(ks[11], (C,), 0.1),
        gn=1.0 + rnd(ks[12], (C,), 0.1),     # nad IN
        bn=rnd(ks[13], (C,), 0.1),
    )


# ------------------------------ pure-JAX reference ------------------------------

def reference(feat, cad, params):
    x = jnp.transpose(feat, (0, 3, 1, 2)).astype(jnp.float32)        # NCHW
    cutoffs = jnp.arange(8.0, 33.0, 2.0, dtype=jnp.float32).reshape(1, NMASK, 1, 1)
    mask = (cad[:, None, :, :] <= cutoffs).astype(jnp.float32)
    x = jnp.concatenate([x, mask], axis=1)

    def inorm(v, g, b):
        mu = v.mean(axis=(2, 3), keepdims=True)
        var = ((v - mu) ** 2).mean(axis=(2, 3), keepdims=True)
        return ((v - mu) / jnp.sqrt(var + EPS)) * g.reshape(1, -1, 1, 1) \
            + b.reshape(1, -1, 1, 1)

    def conv1x1(v, w, b):   # w: (Cout, Cin)
        return jnp.einsum('oc,nchw->nohw', w, v) + b.reshape(1, -1, 1, 1)

    def elu(v):
        return jnp.where(v > 0, v, jnp.exp(jnp.minimum(v, 0.0)) - 1.0)

    p = params
    x = inorm(x, p['g0'], p['b0'])
    y0 = conv1x1(x, p['w1'], p['c1'])
    h = elu(inorm(y0, p['g1'], p['be1']))
    h = conv1x1(h, p['w2'], p['c2'])
    h = elu(inorm(h, p['g2'], p['be2']))
    h = conv1x1(h, p['w3'], p['c3'])
    y = h + y0
    out = elu(inorm(y, p['gn'], p['bn']))
    return jnp.transpose(out, (0, 2, 3, 1))


# ----------------------------------- main -----------------------------------

if __name__ == "__main__":
    N, L, C = 2, 16, 4
    key = jax.random.PRNGKey(0)
    kf, kc, kp = jax.random.split(key, 3)

    feat = jax.random.normal(kf, (N, L, L, C), dtype=jnp.float32)        # featNCLL
    cadistavg = 4.0 + 30.0 * jax.random.uniform(kc, (N, L, L), dtype=jnp.float32)
    params = init_params(kp, C)

    ref = jax.block_until_ready(reference(feat, cadistavg, params))

    # (1) f32 streaming, one batch per grid step (grid length 2 -> v7x megacore)
    out = jax.block_until_ready(for_next_block(feat, cadistavg, params))
    assert out.shape == (N, L, L, C)
    np.testing.assert_allclose(np.asarray(out), np.asarray(ref), rtol=1e-4, atol=1e-4)

    # (2) two batches per grid step (v5e/v6e batching of the grid)
    out_g2 = jax.block_until_ready(
        for_next_block(feat, cadistavg, params, batch_block=2))
    np.testing.assert_allclose(np.asarray(out_g2), np.asarray(ref), rtol=1e-4, atol=1e-4)

    # (3) bf16-streamed feature slab (halves dominant HBM traffic); cad stays f32
    out_bf = jax.block_until_ready(
        for_next_block(feat, cadistavg, params, feat_dtype=jnp.bfloat16))
    np.testing.assert_allclose(np.asarray(out_bf), np.asarray(ref), rtol=0.1, atol=0.1)

    # (4) ragged spatial size (S = 100 -> padded to 128) exercises masked stats
    Lr = 10
    feat_r = jax.random.normal(kf, (N, Lr, Lr, C), dtype=jnp.float32)
    cad_r = 4.0 + 30.0 * jax.random.uniform(kc, (N, Lr, Lr), dtype=jnp.float32)
    out_r = jax.block_until_ready(for_next_block(feat_r, cad_r, params))
    ref_r = jax.block_until_ready(reference(feat_r, cad_r, params))
    np.testing.assert_allclose(np.asarray(out_r), np.asarray(ref_r), rtol=1e-4, atol=1e-4)

    print("KERNEL_OK")
</pallas_src>

<mosaic_0001>
module attributes {stable_mosaic.version = 11 : i64} {
  func.func @for_next_block_kernel(%arg0: i32, %arg1: memref<1x8x256xf32, #tpu.memory_space<vmem>>, %arg2: memref<1x1x256xf32, #tpu.memory_space<vmem>>, %arg3: memref<24x11xf32, #tpu.memory_space<vmem>>, %arg4: memref<8x40xf32, #tpu.memory_space<vmem>>, %arg5: memref<1x8x256xf32, #tpu.memory_space<vmem>>) attributes {dimension_semantics = [#tpu.dimension_semantics<parallel>], iteration_bounds = array<i64: 2>, scalar_prefetch = 0 : i64, scratch_operands = 0 : i64, tpu.core_type = #tpu.core_type<tc>, window_params = [{transform_indices = @transform_0, window_bounds = array<i64: 1, 8, 256>}, {transform_indices = @transform_1, window_bounds = array<i64: 1, 1, 256>}, {pipeline_mode = #tpu.pipeline_mode<synchronous>, transform_indices = @transform_2, window_bounds = array<i64: 24, 11>}, {pipeline_mode = #tpu.pipeline_mode<synchronous>, transform_indices = @transform_3, window_bounds = array<i64: 8, 40>}, {transform_indices = @transform_4, window_bounds = array<i64: 1, 8, 256>}]} {
    %c0 = arith.constant 0 : index
    %c0_0 = arith.constant 0 : index
    %0 = vector.load %arg3[%c0, %c0_0] : memref<24x11xf32, #tpu.memory_space<vmem>>, vector<24x11xf32>
    %c0_1 = arith.constant 0 : index
    %c0_2 = arith.constant 0 : index
    %1 = vector.load %arg4[%c0_1, %c0_2] : memref<8x40xf32, #tpu.memory_space<vmem>>, vector<8x40xf32>
    %2 = vector.extract_strided_slice %0 {offsets = [0, 0], sizes = [8, 1], strides = [1, 1]} : vector<24x11xf32> to vector<8x1xf32>
    %3 = vector.extract_strided_slice %0 {offsets = [0, 1], sizes = [8, 1], strides = [1, 1]} : vector<24x11xf32> to vector<8x1xf32>
    %4 = vector.extract_strided_slice %0 {offsets = [8, 0], sizes = [16, 1], strides = [1, 1]} : vector<24x11xf32> to vector<16x1xf32>
    %5 = vector.extract_strided_slice %0 {offsets = [8, 1], sizes = [16, 1], strides = [1, 1]} : vector<24x11xf32> to vector<16x1xf32>
    %6 = vector.extract_strided_slice %0 {offsets = [0, 2], sizes = [8, 1], strides = [1, 1]} : vector<24x11xf32> to vector<8x1xf32>
    %7 = vector.extract_strided_slice %0 {offsets = [0, 3], sizes = [8, 1], strides = [1, 1]} : vector<24x11xf32> to vector<8x1xf32>
    %8 = vector.extract_strided_slice %0 {offsets = [0, 4], sizes = [8, 1], strides = [1, 1]} : vector<24x11xf32> to vector<8x1xf32>
    %9 = vector.extract_strided_slice %0 {offsets = [0, 5], sizes = [8, 1], strides = [1, 1]} : vector<24x11xf32> to vector<8x1xf32>
    %10 = vector.extract_strided_slice %0 {offsets = [0, 6], sizes = [8, 1], strides = [1, 1]} : vector<24x11xf32> to vector<8x1xf32>
    %11 = vector.extract_strided_slice %0 {offsets = [0, 7], sizes = [8, 1], strides = [1, 1]} : vector<24x11xf32> to vector<8x1xf32>
    %12 = vector.extract_strided_slice %0 {offsets = [0, 8], sizes = [8, 1], strides = [1, 1]} : vector<24x11xf32> to vector<8x1xf32>
    %13 = vector.extract_strided_slice %0 {offsets = [0, 9], sizes = [8, 1], strides = [1, 1]} : vector<24x11xf32> to vector<8x1xf32>
    %14 = vector.extract_strided_slice %0 {offsets = [0, 10], sizes = [8, 1], strides = [1, 1]} : vector<24x11xf32> to vector<8x1xf32>
    %15 = vector.extract_strided_slice %1 {offsets = [0, 0], sizes = [8, 8], strides = [1, 1]} : vector<8x40xf32> to vector<8x8xf32>
    %16 = vector.extract_strided_slice %1 {offsets = [0, 8], sizes = [8, 16], strides = [1, 1]} : vector<8x40xf32> to vector<8x16xf32>
    %17 = vector.extract_strided_slice %1 {offsets = [0, 24], sizes = [8, 8], strides = [1, 1]} : vector<8x40xf32> to vector<8x8xf32>
    %18 = vector.extract_strided_slice %1 {offsets = [0, 32], sizes = [8, 8], strides = [1, 1]} : vector<8x40xf32> to vector<8x8xf32>
    %19 = tpu.iota {dimensions = array<i32: 0>} : vector<16x1xi32>
    %20 = arith.sitofp %19 : vector<16x1xi32> to vector<16x1xf32>
    %cst = arith.constant 2.000000e+00 : f32
    %21 = vector.broadcast %cst : f32 to vector<16x1xf32>
    %22 = arith.mulf %20, %21 : vector<16x1xf32>
    %cst_3 = arith.constant 8.000000e+00 : f32
    %23 = vector.broadcast %cst_3 : f32 to vector<16x1xf32>
    %24 = arith.addf %22, %23 : vector<16x1xf32>
    %c0_4 = arith.constant 0 : index
    %c0_5 = arith.constant 0 : index
    %c0_6 = arith.constant 0 : index
    %25 = vector.load %arg1[%c0_4, %c0_5, %c0_6] : memref<1x8x256xf32, #tpu.memory_space<vmem>>, vector<1x8x256xf32>
    %26 = vector.shape_cast %25 : vector<1x8x256xf32> to vector<8x256xf32>
    %c0_7 = arith.constant 0 : index
    %c0_8 = arith.constant 0 : index
    %c0_9 = arith.constant 0 : index
    %27 = vector.load %arg2[%c0_7, %c0_8, %c0_9] : memref<1x1x256xf32, #tpu.memory_space<vmem>>, vector<1x1x256xf32>
    %28 = vector.shape_cast %27 : vector<1x1x256xf32> to vector<1x256xf32>
    %29 = vector.broadcast %28 : vector<1x256xf32> to vector<16x256xf32>
    %30 = vector.broadcast %24 : vector<16x1xf32> to vector<16x256xf32>
    %31 = arith.cmpf ole, %29, %30 : vector<16x256xf32>
    %32 = arith.extui %31 : vector<16x256xi1> to vector<16x256xi32>
    %33 = arith.sitofp %32 : vector<16x256xi32> to vector<16x256xf32>
    %34 = vector.extract_strided_slice %26 {offsets = [0, 0], sizes = [8, 1], strides = [1, 1]} : vector<8x256xf32> to vector<8x1xf32>
    %35 = vector.broadcast %34 : vector<8x1xf32> to vector<8x256xf32>
    %36 = arith.subf %26, %35 : vector<8x256xf32>
    %cst_10 = arith.constant dense<0.000000e+00> : vector<8xf32>
    %37 = vector.multi_reduction <add>, %36, %cst_10 [1] : vector<8x256xf32> to vector<8xf32>
    %38 = vector.shape_cast %37 : vector<8xf32> to vector<8x1xf32>
    %cst_11 = arith.constant 3.906250e-03 : f32
    %39 = vector.broadcast %cst_11 : f32 to vector<8x1xf32>
    %40 = arith.mulf %38, %39 : vector<8x1xf32>
    %41 = arith.mulf %36, %36 : vector<8x256xf32>
    %cst_12 = arith.constant dense<0.000000e+00> : vector<8xf32>
    %42 = vector.multi_reduction <add>, %41, %cst_12 [1] : vector<8x256xf32> to vector<8xf32>
    %43 = vector.shape_cast %42 : vector<8xf32> to vector<8x1xf32>
    %cst_13 = arith.constant 3.906250e-03 : f32
    %44 = vector.broadcast %cst_13 : f32 to vector<8x1xf32>
    %45 = arith.mulf %43, %44 : vector<8x1xf32>
    %46 = arith.mulf %40, %40 : vector<8x1xf32>
    %47 = arith.subf %45, %46 : vector<8x1xf32>
    %cst_14 = arith.constant 0.000000e+00 : f32
    %48 = vector.broadcast %cst_14 : f32 to vector<8x1xf32>
    %49 = arith.maximumf %47, %48 : vector<8x1xf32>
    %cst_15 = arith.constant 9.99999974E-6 : f32
    %50 = vector.broadcast %cst_15 : f32 to vector<8x1xf32>
    %51 = arith.addf %49, %50 : vector<8x1xf32>
    %52 = math.rsqrt %51 : vector<8x1xf32>
    %53 = arith.mulf %2, %52 : vector<8x1xf32>
    %54 = arith.addf %34, %40 : vector<8x1xf32>
    %55 = arith.mulf %54, %53 : vector<8x1xf32>
    %56 = arith.subf %3, %55 : vector<8x1xf32>
    %cst_16 = arith.constant dense<0.000000e+00> : vector<16xf32>
    %57 = vector.multi_reduction <add>, %33, %cst_16 [1] : vector<16x256xf32> to vector<16xf32>
    %58 = vector.shape_cast %57 : vector<16xf32> to vector<16x1xf32>
    %cst_17 = arith.constant 3.906250e-03 : f32
    %59 = vector.broadcast %cst_17 : f32 to vector<16x1xf32>
    %60 = arith.mulf %58, %59 : vector<16x1xf32>
    %cst_18 = arith.constant 1.000000e+00 : f32
    %61 = vector.broadcast %cst_18 : f32 to vector<16x1xf32>
    %62 = arith.subf %61, %60 : vector<16x1xf32>
    %63 = arith.mulf %60, %62 : vector<16x1xf32>
    %cst_19 = arith.constant 0.000000e+00 : f32
    %64 = vector.broadcast %cst_19 : f32 to vector<16x1xf32>
    %65 = arith.maximumf %63, %64 : vector<16x1xf32>
    %cst_20 = arith.constant 9.99999974E-6 : f32
    %66 = vector.broadcast %cst_20 : f32 to vector<16x1xf32>
    %67 = arith.addf %65, %66 : vector<16x1xf32>
    %68 = math.rsqrt %67 : vector<16x1xf32>
    %69 = arith.mulf %4, %68 : vector<16x1xf32>
    %70 = arith.mulf %60, %69 : vector<16x1xf32>
    %71 = arith.subf %5, %70 : vector<16x1xf32>
    %72 = tpu.transpose %56, [1, 0] : vector<8x1xf32> -> vector<1x8xf32>
    %73 = vector.broadcast %72 : vector<1x8xf32> to vector<8x8xf32>
    %74 = arith.mulf %15, %73 : vector<8x8xf32>
    %cst_21 = arith.constant dense<0.000000e+00> : vector<8xf32>
    %75 = vector.multi_reduction <add>, %74, %cst_21 [1] : vector<8x8xf32> to vector<8xf32>
    %76 = vector.shape_cast %75 : vector<8xf32> to vector<8x1xf32>
    %77 = tpu.transpose %71, [1, 0] : vector<16x1xf32> -> vector<1x16xf32>
    %78 = vector.broadcast %77 : vector<1x16xf32> to vector<8x16xf32>
    %79 = arith.mulf %16, %78 : vector<8x16xf32>
    %cst_22 = arith.constant dense<0.000000e+00> : vector<8xf32>
    %80 = vector.multi_reduction <add>, %79, %cst_22 [1] : vector<8x16xf32> to vector<8xf32>
    %81 = vector.shape_cast %80 : vector<8xf32> to vector<8x1xf32>
    %82 = arith.addf %76, %81 : vector<8x1xf32>
    %83 = arith.addf %82, %6 : vector<8x1xf32>
    %84 = tpu.transpose %53, [1, 0] : vector<8x1xf32> -> vector<1x8xf32>
    %85 = vector.broadcast %84 : vector<1x8xf32> to vector<8x8xf32>
    %86 = arith.mulf %15, %85 : vector<8x8xf32>
    %cst_23 = arith.constant dense<0.000000e+00> : vector<8x256xf32>
    %87 = tpu.matmul %86, %26, %cst_23 {dimension_numbers = #tpu.dot_dimension_numbers<[1], [0], [0], [1], [0, 0, 1, 1], [], []>} : vector<8x8xf32>, vector<8x256xf32>, vector<8x256xf32> -> vector<8x256xf32>
    %88 = tpu.transpose %69, [1, 0] : vector<16x1xf32> -> vector<1x16xf32>
    %89 = vector.broadcast %88 : vector<1x16xf32> to vector<8x16xf32>
    %90 = arith.mulf %16, %89 : vector<8x16xf32>
    %cst_24 = arith.constant dense<0.000000e+00> : vector<8x256xf32>
    %91 = tpu.matmul %90, %33, %cst_24 {dimension_numbers = #tpu.dot_dimension_numbers<[1], [0], [0], [1], [0, 0, 1, 1], [], []>} : vector<8x16xf32>, vector<16x256xf32>, vector<8x256xf32> -> vector<8x256xf32>
    %92 = arith.addf %87, %91 : vector<8x256xf32>
    %93 = vector.broadcast %83 : vector<8x1xf32> to vector<8x256xf32>
    %94 = arith.addf %92, %93 : vector<8x256xf32>
    %cst_25 = arith.constant dense<0.000000e+00> : vector<8xf32>
    %95 = vector.multi_reduction <add>, %94, %cst_25 [1] : vector<8x256xf32> to vector<8xf32>
    %96 = vector.shape_cast %95 : vector<8xf32> to vector<8x1xf32>
    %cst_26 = arith.constant 3.906250e-03 : f32
    %97 = vector.broadcast %cst_26 : f32 to vector<8x1xf32>
    %98 = arith.mulf %96, %97 : vector<8x1xf32>
    %99 = arith.mulf %94, %94 : vector<8x256xf32>
    %cst_27 = arith.constant dense<0.000000e+00> : vector<8xf32>
    %100 = vector.multi_reduction <add>, %99, %cst_27 [1] : vector<8x256xf32> to vector<8xf32>
    %101 = vector.shape_cast %100 : vector<8xf32> to vector<8x1xf32>
    %cst_28 = arith.constant 3.906250e-03 : f32
    %102 = vector.broadcast %cst_28 : f32 to vector<8x1xf32>
    %103 = arith.mulf %101, %102 : vector<8x1xf32>
    %104 = arith.mulf %98, %98 : vector<8x1xf32>
    %105 = arith.subf %103, %104 : vector<8x1xf32>
    %cst_29 = arith.constant 0.000000e+00 : f32
    %106 = vector.broadcast %cst_29 : f32 to vector<8x1xf32>
    %107 = arith.maximumf %105, %106 : vector<8x1xf32>
    %cst_30 = arith.constant 9.99999974E-6 : f32
    %108 = vector.broadcast %cst_30 : f32 to vector<8x1xf32>
    %109 = arith.addf %107, %108 : vector<8x1xf32>
    %110 = math.rsqrt %109 : vector<8x1xf32>
    %111 = arith.mulf %7, %110 : vector<8x1xf32>
    %112 = vector.broadcast %111 : vector<8x1xf32> to vector<8x256xf32>
    %113 = arith.mulf %94, %112 : vector<8x256xf32>
    %114 = arith.mulf %98, %111 : vector<8x1xf32>
    %115 = arith.subf %8, %114 : vector<8x1xf32>
    %116 = vector.broadcast %115 : vector<8x1xf32> to vector<8x256xf32>
    %117 = arith.addf %113, %116 : vector<8x256xf32>
    %cst_31 = arith.constant 0.000000e+00 : f32
    %118 = vector.broadcast %cst_31 : f32 to vector<8x256xf32>
    %119 = arith.cmpf ogt, %117, %118 : vector<8x256xf32>
    %cst_32 = arith.constant 0.000000e+00 : f32
    %120 = vector.broadcast %cst_32 : f32 to vector<8x256xf32>
    %121 = arith.minimumf %117, %120 : vector<8x256xf32>
    %122 = math.exp %121 : vector<8x256xf32>
    %cst_33 = arith.constant 1.000000e+00 : f32
    %123 = vector.broadcast %cst_33 : f32 to vector<8x256xf32>
    %124 = arith.subf %122, %123 : vector<8x256xf32>
    %125 = arith.select %119, %117, %124 : vector<8x256xi1>, vector<8x256xf32>
    %cst_34 = arith.constant dense<0.000000e+00> : vector<8x256xf32>
    %126 = tpu.matmul %17, %125, %cst_34 {dimension_numbers = #tpu.dot_dimension_numbers<[1], [0], [0], [1], [0, 0, 1, 1], [], []>} : vector<8x8xf32>, vector<8x256xf32>, vector<8x256xf32> -> vector<8x256xf32>
    %127 = vector.broadcast %9 : vector<8x1xf32> to vector<8x256xf32>
    %128 = arith.addf %126, %127 : vector<8x256xf32>
    %cst_35 = arith.constant dense<0.000000e+00> : vector<8xf32>
    %129 = vector.multi_reduction <add>, %128, %cst_35 [1] : vector<8x256xf32> to vector<8xf32>
    %130 = vector.shape_cast %129 : vector<8xf32> to vector<8x1xf32>
    %cst_36 = arith.constant 3.906250e-03 : f32
    %131 = vector.broadcast %cst_36 : f32 to vector<8x1xf32>
    %132 = arith.mulf %130, %131 : vector<8x1xf32>
    %133 = arith.mulf %128, %128 : vector<8x256xf32>
    %cst_37 = arith.constant dense<0.000000e+00> : vector<8xf32>
    %134 = vector.multi_reduction <add>, %133, %cst_37 [1] : vector<8x256xf32> to vector<8xf32>
    %135 = vector.shape_cast %134 : vector<8xf32> to vector<8x1xf32>
    %cst_38 = arith.constant 3.906250e-03 : f32
    %136 = vector.broadcast %cst_38 : f32 to vector<8x1xf32>
    %137 = arith.mulf %135, %136 : vector<8x1xf32>
    %138 = arith.mulf %132, %132 : vector<8x1xf32>
    %139 = arith.subf %137, %138 : vector<8x1xf32>
    %cst_39 = arith.constant 0.000000e+00 : f32
    %140 = vector.broadcast %cst_39 : f32 to vector<8x1xf32>
    %141 = arith.maximumf %139, %140 : vector<8x1xf32>
    %cst_40 = arith.constant 9.99999974E-6 : f32
    %142 = vector.broadcast %cst_40 : f32 to vector<8x1xf32>
    %143 = arith.addf %141, %142 : vector<8x1xf32>
    %144 = math.rsqrt %143 : vector<8x1xf32>
    %145 = arith.mulf %10, %144 : vector<8x1xf32>
    %146 = vector.broadcast %145 : vector<8x1xf32> to vector<8x256xf32>
    %147 = arith.mulf %128, %146 : vector<8x256xf32>
    %148 = arith.mulf %132, %145 : vector<8x1xf32>
    %149 = arith.subf %11, %148 : vector<8x1xf32>
    %150 = vector.broadcast %149 : vector<8x1xf32> to vector<8x256xf32>
    %151 = arith.addf %147, %150 : vector<8x256xf32>
    %cst_41 = arith.constant 0.000000e+00 : f32
    %152 = vector.broadcast %cst_41 : f32 to vector<8x256xf32>
    %153 = arith.cmpf ogt, %151, %152 : vector<8x256xf32>
    %cst_42 = arith.constant 0.000000e+00 : f32
    %154 = vector.broadcast %cst_42 : f32 to vector<8x256xf32>
    %155 = arith.minimumf %151, %154 : vector<8x256xf32>
    %156 = math.exp %155 : vector<8x256xf32>
    %cst_43 = arith.constant 1.000000e+00 : f32
    %157 = vector.broadcast %cst_43 : f32 to vector<8x256xf32>
    %158 = arith.subf %156, %157 : vector<8x256xf32>
    %159 = arith.select %153, %151, %158 : vector<8x256xi1>, vector<8x256xf32>
    %cst_44 = arith.constant dense<0.000000e+00> : vector<8x256xf32>
    %160 = tpu.matmul %18, %159, %cst_44 {dimension_numbers = #tpu.dot_dimension_numbers<[1], [0], [0], [1], [0, 0, 1, 1], [], []>} : vector<8x8xf32>, vector<8x256xf32>, vector<8x256xf32> -> vector<8x256xf32>
    %161 = vector.broadcast %12 : vector<8x1xf32> to vector<8x256xf32>
    %162 = arith.addf %160, %161 : vector<8x256xf32>
    %163 = arith.addf %162, %94 : vector<8x256xf32>
    %cst_45 = arith.constant dense<0.000000e+00> : vector<8xf32>
    %164 = vector.multi_reduction <add>, %163, %cst_45 [1] : vector<8x256xf32> to vector<8xf32>
    %165 = vector.shape_cast %164 : vector<8xf32> to vector<8x1xf32>
    %cst_46 = arith.constant 3.906250e-03 : f32
    %166 = vector.broadcast %cst_46 : f32 to vector<8x1xf32>
    %167 = arith.mulf %165, %166 : vector<8x1xf32>
    %168 = arith.mulf %163, %163 : vector<8x256xf32>
    %cst_47 = arith.constant dense<0.000000e+00> : vector<8xf32>
    %169 = vector.multi_reduction <add>, %168, %cst_47 [1] : vector<8x256xf32> to vector<8xf32>
    %170 = vector.shape_cast %169 : vector<8xf32> to vector<8x1xf32>
    %cst_48 = arith.constant 3.906250e-03 : f32
    %171 = vector.broadcast %cst_48 : f32 to vector<8x1xf32>
    %172 = arith.mulf %170, %171 : vector<8x1xf32>
    %173 = arith.mulf %167, %167 : vector<8x1xf32>
    %174 = arith.subf %172, %173 : vector<8x1xf32>
    %cst_49 = arith.constant 0.000000e+00 : f32
    %175 = vector.broadcast %cst_49 : f32 to vector<8x1xf32>
    %176 = arith.maximumf %174, %175 : vector<8x1xf32>
    %cst_50 = arith.constant 9.99999974E-6 : f32
    %177 = vector.broadcast %cst_50 : f32 to vector<8x1xf32>
    %178 = arith.addf %176, %177 : vector<8x1xf32>
    %179 = math.rsqrt %178 : vector<8x1xf32>
    %180 = arith.mulf %13, %179 : vector<8x1xf32>
    %181 = vector.broadcast %180 : vector<8x1xf32> to vector<8x256xf32>
    %182 = arith.mulf %163, %181 : vector<8x256xf32>
    %183 = arith.mulf %167, %180 : vector<8x1xf32>
    %184 = arith.subf %14, %183 : vector<8x1xf32>
    %185 = vector.broadcast %184 : vector<8x1xf32> to vector<8x256xf32>
    %186 = arith.addf %182, %185 : vector<8x256xf32>
    %cst_51 = arith.constant 0.000000e+00 : f32
    %187 = vector.broadcast %cst_51 : f32 to vector<8x256xf32>
    %188 = arith.cmpf ogt, %186, %187 : vector<8x256xf32>
    %cst_52 = arith.constant 0.000000e+00 : f32
    %189 = vector.broadcast %cst_52 : f32 to vector<8x256xf32>
    %190 = arith.minimumf %186, %189 : vector<8x256xf32>
    %191 = math.exp %190 : vector<8x256xf32>
    %cst_53 = arith.constant 1.000000e+00 : f32
    %192 = vector.broadcast %cst_53 : f32 to vector<8x256xf32>
    %193 = arith.subf %191, %192 : vector<8x256xf32>
    %194 = arith.select %188, %186, %193 : vector<8x256xi1>, vector<8x256xf32>
    %c0_54 = arith.constant 0 : index
    %c0_55 = arith.constant 0 : index
    %c0_56 = arith.constant 0 : index
    %195 = vector.load %arg5[%c0_54, %c0_55, %c0_56] : memref<1x8x256xf32, #tpu.memory_space<vmem>>, vector<1x8x256xf32>
    %196 = vector.shape_cast %195 : vector<1x8x256xf32> to vector<8x256xf32>
    %197 = vector.shape_cast %194 : vector<8x256xf32> to vector<1x8x256xf32>
    tpu.vector_store %arg5[%c0_54, %c0_55, %c0_56], %197 {strides = array<i32>} : memref<1x8x256xf32, #tpu.memory_space<vmem>>, vector<1x8x256xf32>,
    return
  }
  func.func @transform_0(%arg0: i32) -> (i32, i32, i32) {
    %c0_i32 = arith.constant 0 : i32
    %c0_i32_0 = arith.constant 0 : i32
    %c0_i32_1 = arith.constant 0 : i32
    return %arg0, %c0_i32, %c0_i32_0 : i32, i32, i32
  }
  func.func @transform_1(%arg0: i32) -> (i32, i32, i32) {
    %c0_i32 = arith.constant 0 : i32
    %c0_i32_0 = arith.constant 0 : i32
    %c0_i32_1 = arith.constant 0 : i32
    return %arg0, %c0_i32, %c0_i32_0 : i32, i32, i32
  }
  func.func @transform_2(%arg0: i32) -> (i32, i32) {
    %c0_i32 = arith.constant 0 : i32
    %c0_i32_0 = arith.constant 0 : i32
    %c0_i32_1 = arith.constant 0 : i32
    return %c0_i32, %c0_i32_0 : i32, i32
  }
  func.func @transform_3(%arg0: i32) -> (i32, i32) {
    %c0_i32 = arith.constant 0 : i32
    %c0_i32_0 = arith.constant 0 : i32
    %c0_i32_1 = arith.constant 0 : i32
    return %c0_i32, %c0_i32_0 : i32, i32
  }
  func.func @transform_4(%arg0: i32) -> (i32, i32, i32) {
    %c0_i32 = arith.constant 0 : i32
    %c0_i32_0 = arith.constant 0 : i32
    %c0_i32_1 = arith.constant 0 : i32
    return %arg0, %c0_i32, %c0_i32_0 : i32, i32, i32
  }
}

</mosaic_0001>

<bundles_post_ra>
// kernel: tpu_custom_call.1
= control target key start
LH: loop header
LB: loop body
LE: loop exit
PB: predicated region body
PF: predicated region fallthrough
CT: control target
= control target key end

     0   :  { %9 = vsyncpa [#allocation3], 0  ;;  %s1659_s0 = inlined_call_operand.vmem [shape: f32[2,8,256], index: 0, kind: input, shape index: {}]   ;;  %s1660_s1 = inlined_call_operand.hbm [shape: f32[2,1,256], index: 1, kind: input, shape index: {}]   ;;  %s1661_s2 = inlined_call_operand.vmem [shape: f32[24,11], index: 2, kind: input, shape index: {}]   ;;  %s1662_s3 = inlined_call_operand.vmem [shape: f32[8,40], index: 3, kind: input, shape index: {}]   ;;  %s1663_s4 = inlined_call_operand.hbm [shape: f32[2,8,256], index: 4, kind: output, shape index: {}]  }
   0x1   :  { %11 = vsyncpa [#allocation3 + $0x1], 0 }
   0x2   :  { %12 = vsyncpa [#allocation4], 0 }
   0x3   :  { %14 = vsyncpa [#allocation4 + $0x1], 0  ;;  %s1363_s15 = smov 0   ;;  %s1365_s16 = smov 0  }
   0x4   :  { %s1367_s17 = smov 0   ;;  %s1369_s18 = smov 0  }
   0x5 LB: > { %s1384_s19 = sadd.s32 4294967295, %s1316_s18   ;;  %s1079_s20 = sadd.s32 4294967294, %s1316_s18   ;;  %s1316_s18 = sphi %s1369_s18, %s1678_s18   ;;  %s1312_s17 = sphi %s1367_s17, %s1677_s17   ;;  %s1308_s16 = sphi %s1365_s16, %s1676_s16   ;;  %s1304_s15 = sphi %s1363_s15, %s1675_s15  }
   0x6   : > { %s1388_s21 = sadd.s32 1, %s1316_s18   ;;  %s53_s22 = sadd.s32 1, %s1312_s17 }
   0x7   : > { %s50_s23 = ssub.s32 %s1316_s18, %s1388_s21  ;;  %p60_p0 = scmp.ne.s32.totalorder %s1312_s17, %s1308_s16 }
   0x8   : > { %p51_p1 = scmp.eq.s32.totalorder %s50_s23, 0  ;;  %p61_p2 = scmp.eq.s32.totalorder %s1316_s18, 0 }
   0x9   : > { %p66_p3 = scmp.ne.s32.totalorder %s1308_s16, %s1304_s15  ;;  %p67_p4 = scmp.eq.s32.totalorder %s1384_s19, 0 }
   0xa   : > { %s1400_s24 = scalar_select %p51_p1, %s1312_s17, %s53_s22  }
   0xb   : > { %p1402_p5 = por %p61_p2, %p60_p0  ;;  %p1406_p6 = por %p67_p4, %p66_p3 }
   0xc   : > { %p132_p7 = scmp.eq.s32.totalorder %s1384_s19, 1  ;;  %p138_p8 = scmp.eq.s32.totalorder %s1079_s20, 1 }
   0xd   : > { %p1134_p10 = scmp.lt.s32.totalorder %s1316_s18, 2  ;;  %s172_s29 = sand.u32 1, %s1312_s17  }
   0xe   : > { %p1413_p11 = por %p132_p7, %p60_p0  ;;  %p1417_p12 = por %p138_p8, %p66_p3 }
   0xf   : > { %s1113_s30 = sshll.u32 %s1316_s18, 5  ;;  %s1082_s5 = sshll.u32 %s172_s29, 1 }
  0x10   : > { %s1667_s27 = scalar_select %p1413_p11, 1, 0 }
  0x11   : > { %s1668_s28 = scalar_select %p1417_p12, 1, 0 }
  0x12   : > { %s1426_s8 = scalar_lea.hbm %s1660_s1, %s1113_s30  ;;  %s176_s9 = scalar_lea.vmem [#allocation2], %s1082_s5 }
  0x13   : > { %s184_s10 = sshll.u32 %s176_s9, 4  ;;  %p1430_p13 = pnand %p1134_p10, %p1402_p5  ;;  %s1434_s10 = int_to_ptr.vmem [resolvable:$true] %s184_s10 }
  0x14   : > { %s173_s12 = scalar_lea.sflag [#allocation3], %s172_s29  ;;  %s1220_s13 = scalar_lea.hbm %s1426_s8, 32 }
  0x15   : > { %p1221_p2 = scmp.ne.s32.totalorder %s1426_s8, %s1220_s13  ;;  %p1222_p3 = pneg %p1430_p13 }
  0x16   : > { %s1225_s22 = scalar_lea.hbm %s1660_s1, 64  ;;  %p1226_p5 = scmp.lt.u32.totalorder %s1426_s8, %s1660_s1 }
  0x17   : > { %p1223_p4 = pnand %p1222_p3, %p1221_p2  ;;  %p1227_p8 = scmp.lt.u32.totalorder %s1225_s22, %s1220_s13 }
  0x18   : > { %p1229_p9 = scmp.lt.u32.totalorder %s1220_s13, %s1426_s8 }
  0x19   : > { %p1224_p7 = pneg %p1223_p4  ;;  %p1228_p10 = por %p1227_p8, %p1226_p5 }
  0x1b   : > { %p1230_p0 = por %p1229_p9, %p1228_p10 }
  0x1d   : > { %p1231_p1 = pnand %p1230_p0, %p1224_p7 }
  0x1f   : > { %1234 = shalt.err (!%p1231_p1)
}
  0x20   : > { %s1235_s29 = scalar_lea.vmem %s1434_s10, 32  ;;  %s1318_s30 = smov [#allocation2]  }
  0x21   : > { %p1236_p2 = scmp.ne.s32.totalorder %s1434_s10, %s1235_s29  ;;  %s1240_s5 = sshll.u32 %s1318_s30, 4  ;;  %s1241_s5 = int_to_ptr.vmem [resolvable:$false] %s1240_s5 }
  0x22   : > { %s1242_s6 = scalar_lea.vmem %s1241_s5, 64  ;;  %p1243_p11 = scmp.lt.s32.totalorder %s1434_s10, %s1241_s5 }
  0x23   : > { %p1238_p4 = pnand %p1236_p2, %p1222_p3  ;;  %p1244_p5 = scmp.lt.s32.totalorder %s1242_s6, %s1235_s29 }
  0x25   : > { %p1239_p12 = pneg %p1238_p4  ;;  %p1245_p8 = por %p1244_p5, %p1243_p11 }
  0x27   : > { %p1246_p9 = pnand %p1245_p8, %p1239_p12 }
  0x29   : > { %1249 = shalt.err (!%p1246_p9)
}
  0x2a   : > { %1129 = dma.hbm_to_vmem [thread:$0]  (!%p1430_p13), %s1426_s8, 32, %s1434_s10, %s173_s12  }
  0x2b   : > { %p1670_p0 = scmp.lt.s32.totalorder %s1316_s18, 3  ;;  %p1671_p1 = scmp.ge.s32.totalorder %s1316_s18, 1 }
  0x2d   : > { %p190_p3 = pnand %p1671_p1, %p1670_p0 }
  0x2e   : > { %s1468_s7 = sand.u32 (!%p190_p3), 1, %s1308_s16  }
  0x2f   : > { %193 = sbr.rel (%p190_p3) target bundleno = 2887 (0xb47), region = 36  ;;  %s1086_s9 = sshll.u32 (!%p190_p3), %s1468_s7, 1 }
  0x30   : > { %s196_s13 = scalar_lea.sflag (!%p190_p3), [#allocation3], %s1468_s7  ;;  %s199_s14 = scalar_lea.vmem (!%p190_p3), [#allocation2], %s1086_s9 }
  0x36   : > { %1295 = dma.done.wait (%p1406_p6), %s196_s13, 32  }
  0x37   : > { %1297 = vsyncadd (%p1406_p6), %s196_s13, 4294967264  ;;  %v238_v0 = vlaneseq  ;;  %p229_p11 = scmp.lt.s32.totalorder %s1384_s19, 1  ;;  %v1319_v1 = vmov 0   ;;  %v1320_v2 = vmov 0.0   ;;  %v249_v10 = vld [vmem:[%s199_s14] sm:$0x3] }
  0x38   : > { %1186 = vset.pattern.permute.xlu1 %v1319_v1  ;;  %586 = vmatprep.mubr.f32.mxu0 %v1320_v2  ;;  %v235_v43 = vld [vmem:[%s1661_s2 + $0x8] sm:$0xff]  ;;  %v236_v46 = vld [vmem:[%s1661_s2 + $0x10] sm:$0xff]  ;;  %s1321_s29 = smov 1   ;;  %s1322_s30 = smov 127   ;;  %v1540_v1 = vld [vmem:[%s1661_s2] sm:$0xff]  ;;  %vm433_vm6 = vcmask 130048  }
  0x39   : > { %v239_v3 = vshrl.u32 %v238_v0, 7  ;;  %s230_s8 = scalar_select %p229_p11, %s1384_s19, 1  ;;  %796 = vmatprep.mubr.f32.mxu1 %v1320_v2  ;;  %vm376_vm7 = vcmask 64512  }
  0x3a   : > { %s1323_s5 = smov 8   ;;  %s1333_s10 = smov 96  }
  0x3b   : > { %v241_v4 = vcvt.s32.f32 %v239_v3  ;;  %v1480_v5 = vsub.s32 0, %v239_v3  ;;  %v257_v6 = vsub.s32 1, %v239_v3  ;;  %v240_v7 = vadd.s32 8, %v239_v3  ;;  %s1114_s26 = sshll.u32 %s230_s8, 4  ;;  %s1325_s8 = smov 120  }
  0x3c   : > { %s233_s12 = scalar_lea.vmem %s1659_s0, %s1114_s26  ;;  %s1329_s26 = smov 104  }
  0x3d   : > { %v243_v8 = vmul.f32 2.0, %v241_v4  ;;  %v242_v9 = vcvt.s32.f32 %v240_v7  ;;  %v1485_v11 = vld [vmem:[%s233_s12] sm:$0xff]  ;;  %v1490_v13 = vrot.slane %v249_v10, %v1480_v5  ;;  %v1492_v14 = vrot.slane %v249_v10, %v257_v6  ;;  %v1521_v23 = vld [vmem:[%s233_s12 + $0x8] sm:$0xff]  ;;  %s1087_s11 = sshll.u32 %s1468_s7, 4  ;;  %s1115_s12 = sshll.u32 %s1384_s19, 8 }
  0x3e   : > { %275 = vperm.xlu1 %1186, %v1485_v11   ;;  %v1324_v10 = vmov 1.0|1.0   ;;  %s228_s20 = scalar_lea.vmem [#allocation5], %s1087_s11  ;;  %s983_s19 = scalar_lea.sflag [#allocation4], %s1468_s7 }
  0x3f   : > { %v1487_v12 = vadd.f32 8.0, %v243_v8  ;;  %v244_v15 = vmul.f32 2.0, %v242_v9  ;;  %s997_s22 = sshll.u32 %s228_s20, 4  ;;  %p1672_p12 = scmp.ne.s32.totalorder %s1667_s27, 0  ;;  %s1617_s22 = int_to_ptr.vmem [resolvable:$true] %s997_s22 }
  0x41   : > { %vm261_vm0 = vcmp.le.f32.partialorder %v1490_v13, %v1487_v12  ;;  %vm262_vm1 = vcmp.le.f32.partialorder %v1492_v14, %v1487_v12  ;;  %v1499_v16 = vadd.f32 8.0, %v244_v15  ;;  %v1561_v15 = vld [vmem:[%s1662_s3] sm:$0xff] }
  0x42   : > { %v1090_v17 = vsel %vm261_vm0, 1.0, %v1320_v2  ;;  %v1091_v18 = vsel %vm262_vm1, 1.0, %v1320_v2 }
  0x43   : > { %v303_v19 = vadd.f32 %v1091_v18, %v1090_v17  ;;  %vm263_vm2 = vcmp.le.f32.partialorder %v1490_v13, %v1499_v16  ;;  %vm264_vm3 = vcmp.le.f32.partialorder %v1492_v14, %v1499_v16 }
  0x44   : > { %v1092_v20 = vsel %vm263_vm2, 1.0, %v1320_v2  ;;  %v1093_v21 = vsel %vm264_vm3, 1.0, %v1320_v2  ;;  %vm1116_vm4 = vmpackc.low %vm264_vm3, %vm262_vm1 }
  0x45   : > { %304 = vadd.xlane.f32.xlu0 %v303_v19  ;;  %v306_v22 = vadd.f32 %v1093_v21, %v1092_v20  ;;  %1117 = vmatprep.subr.msk.bf16.mxu0 %vm1116_vm4, %v1324_v10  ;;  %vm1118_vm5 = vmpackc.low %vm263_vm2, %vm261_vm0 }
  0x46   : > { %1119 = vmatpush1.bf16.msk.msra.mxu0 %vm1118_vm5, %v1324_v10 }
  0x47   : > { %596 = vmatprep.subr.mxu0 %v1521_v23 }
  0x49   : > { %307 = vadd.xlane.f32.xlu0 %v306_v22 }
  0xbd   : > { %v276_v24 = vpop.permute.xlu1 %275 }
  0xbe   : > { %v278_v25 = vsub.f32 %v1485_v11, %v276_v24  ;;  %v279_v26 = vsub.f32 %v1521_v23, %v276_v24 }
  0xc0   : > { %v280_v27 = vadd.f32 %v279_v26, %v278_v25  ;;  %v284_v28 = vmul.f32 %v278_v25, %v278_v25  ;;  %v285_v29 = vmul.f32 %v279_v26, %v279_v26 }
  0xc2   : > { %281 = vadd.xlane.f32.xlu1 %v280_v27  ;;  %v286_v30 = vadd.f32 %v285_v29, %v284_v28 }
  0xd2   : > { %v305_v31 = vpop.xlane.xlu0 %304 }
  0xd3   : > { %v309_v32 = vmul.f32 0.00390625, %v305_v31  ;;  %v1326_v31 = vmov 2  }
  0xd5   : > { %v311_v33 = vsub.f32 1.0, %v309_v32 }
  0xd6   : > { %v308_v34 = vpop.xlane.xlu0 %307 }
  0xd7   : > { %v313_v35 = vmul.f32 %v311_v33, %v309_v32  ;;  %v310_v36 = vmul.f32 0.00390625, %v308_v34 }
  0xd9   : > { %v315_v37 = vmax.f32 %v313_v35, 0.0  ;;  %v312_v38 = vsub.f32 1.0, %v310_v36 }
  0xdb   : > { %v317_v39 = vadd.f32 1e-05, %v315_v37  ;;  %v314_v40 = vmul.f32 %v312_v38, %v310_v36 }
  0xdd   : > { %1196 = vrsqrt.f32 %v317_v39  ;;  %v316_v41 = vmax.f32 %v314_v40, 0.0 }
  0xdf   : > { %v318_v42 = vadd.f32 1e-05, %v316_v41 }
  0xe1   : > { %1198 = vrsqrt.f32 %v318_v42 }
  0xe7   : > { %v1197_v44 = vpop.eup %1196 }
  0xe8   : > { %v321_v45 = vmul.f32 %v1197_v44, %v235_v43  ;;  %v1327_v44 = vmov 3  }
  0xea   : > { %v323_v47 = vmul.f32 %v321_v45, %v309_v32 }
  0xeb   : > { %v1199_v48 = vpop.eup %1198 }
  0xec   : > { %327 = vrot.lane.b32.xlu1 %v323_v47, %s1321_s29  ;;  %v322_v49 = vmul.f32 %v1199_v48, %v236_v46 }
  0xee   : > { %v324_v50 = vmul.f32 %v322_v49, %v310_v36 }
  0xf0   : > { %329 = vrot.lane.b32.xlu0 %v324_v50, %s1321_s29 }
 0x10f   : > { %287 = vadd.xlane.f32.xlu0 %v286_v30 }
 0x115   : > { %476 = vxpose.xlu1.b32.start [1/2] (short) (narrow) %v321_v45, 8 }
 0x119   : > { %477 = vxpose.xlu1.b32.end [2/2] (short) (narrow) %v322_v49, 8 }
 0x14f   : > { %v282_v51 = vpop.xlane.xlu1 %281 }
 0x150   : > { %v283_v58 = vmul.f32 0.00390625, %v282_v51 }
 0x152   : > { %v290_v60 = vmul.f32 %v283_v58, %v283_v58  ;;  %v296_v4 = vadd.f32 %v283_v58, %v1485_v11 }
 0x15e   : > { %v328_v52 = vpop.permute.xlu1 %327 }
 0x15f   : > { %v333_v53 = vsub.f32 %v235_v43, %v328_v52 }
 0x161   : > { %382 = vrot.lane.b32.xlu0 %v333_v53, %s1322_s30  ;;  %v1328_v53 = vmov 4  }
 0x162   : > { %v330_v54 = vpop.permute.xlu0 %329 }
 0x163   : > { %v334_v55 = vsub.f32 %v236_v46, %v330_v54 }
 0x165   : > { %384 = vrot.lane.b32.xlu0 %v334_v55, %s1322_s30 }
 0x195   : > { %v492_v56 = vpop.trf.xlu1 }
 0x196   : > { %v511_v57 = vrot.slane %v492_v56, %v1480_v5 }
 0x198   : > { %513 = vrot.lane.b32.xlu0 %v511_v57, %s1323_s5 }
 0x19c   : > { %v288_v59 = vpop.xlane.xlu0 %287 }
 0x19d   : > { %v289_v61 = vmul.f32 0.00390625, %v288_v59  ;;  %v1330_v59 = vmov 5  }
 0x19f   : > { %v291_v62 = vsub.f32 %v289_v61, %v290_v60 }
 0x1a1   : > { %v292_v63 = vmax.f32 %v291_v62, 0.0 }
 0x1a3   : > { %v293_v0 = vadd.f32 1e-05, %v292_v63 }
 0x1a5   : > { %1200 = vrsqrt.f32 %v293_v0 }
 0x1af   : > { %v1201_v3 = vpop.eup %1200 }
 0x1b0   : > { %v295_v6 = vmul.f32 %v1201_v3, %v1540_v1 }
 0x1b2   : > { %v297_v7 = vmul.f32 %v296_v4, %v295_v6 }
 0x1b4   : > { %299 = vrot.lane.b32.xlu0 %v297_v7, %s1321_s29 }
 0x1d3   : > { %v383_v8 = vpop.permute.xlu0 %382 }
 0x1d4   : > { %388 = vxpose.xlu0.b32.start [1/2] (short) (narrow) %v383_v8, 8 }
 0x1d7   : > { %v385_v9 = vpop.permute.xlu0 %384 }
 0x1d8   : > { %389 = vxpose.xlu0.b32.end [2/2] (short) (narrow) %v385_v9, 8 }
 0x20a   : > { %v514_v17 = vpop.permute.xlu0 %513 }
 0x20b   : > { %v516_v14 = vmul.f32 %v514_v17, %v1561_v15 }
 0x20d   : > { %518 = vrot.lane.b32.xlu1 %v516_v14, %s1325_s8 }
 0x226   : > { %v300_v18 = vpop.permute.xlu0 %299 }
 0x227   : > { %v302_v13 = vsub.f32 %v1540_v1, %v300_v18 }
 0x236   : > { %439 = vxpose.xlu1.b32.start.end [1/1] (short) (narrow) %v295_v6, 8 }
 0x254   : > { %v404_v12 = vpop.trf.xlu0  ;;  %1187 = vset.pattern.permute.xlu1 %v1326_v31 }
 0x255   : > { %v423_v19 = vrot.slane %v404_v12, %v1480_v5 }
 0x257   : > { %425 = vrot.lane.b32.xlu0 %v423_v19, %s1323_s5  ;;  %s1337_s5 = smov [#allocation5]  }
 0x258   : > { %s1254_s6 = sshll.u32 %s1337_s5, 4  ;;  %s1255_s6 = int_to_ptr.vmem [resolvable:$false] %s1254_s6 }
 0x259   : > { %s1256_s9 = scalar_lea.vmem %s1255_s6, 512  ;;  %p1257_p10 = scmp.lt.s32.totalorder %s1617_s22, %s1255_s6 }
 0x25b   : > { %336 = vrot.lane.b32.xlu0 %v302_v13, %s1322_s30  ;;  %s1250_s30 = scalar_lea.vmem %s1617_s22, 256 }
 0x25c   : > { %p1251_p6 = scmp.ne.s32.totalorder %s1617_s22, %s1250_s30  ;;  %p1258_p2 = scmp.lt.s32.totalorder %s1256_s9, %s1250_s30 }
 0x25e   : > { %p1252_p13 = pnand %p1251_p6, %p1672_p12  ;;  %p1259_p4 = por %p1258_p2, %p1257_p10 }
 0x260   : > { %p1253_p7 = pneg %p1252_p13 }
 0x262   : > { %p1260_p5 = pnand %p1259_p4, %p1253_p7 }
 0x27f   : > { %v519_v16 = vpop.permute.xlu1 %518 }
 0x280   : > { %1098 = vmatmul.mubr.msk.f32.vlgmr.msra.gmra.mrb[0].mxu0 %vm433_vm6, %v519_v16 }
 0x281   : > { %597 = vmatpush1.msra.mxu0 %v1485_v11  ;;  %660 = vmatprep.mubr.f32.mxu0 %v1320_v2 }
 0x2b6   : > { %v455_v20 = vpop.trf.xlu1 }
 0x2b7   : > { %v474_v21 = vrot.slane %v455_v20, %v1480_v5 }
 0x2b9   : > { %v475_v22 = vmul.f32 %v474_v21, %v1561_v15 }
 0x2bb   : > { %1099 = vmatmul.mubr.msk.f32.vlgmr.msra.gmra.mrb[0].mxu0 %vm376_vm7, %v475_v22 }
 0x2c9   : > { %v426_v23 = vpop.permute.xlu0 %425 }
 0x2ca   : > { %v428_v24 = vmul.f32 %v426_v23, %v1561_v15 }
 0x2cc   : > { %430 = vrot.lane.b32.xlu1 %v428_v24, %s1325_s8 }
 0x2cd   : > { %v337_v25 = vpop.permute.xlu0 %336 }
 0x2ce   : > { %339 = vxpose.xlu0.b32.start.end [1/1] (short) (narrow) %v337_v25, 8 }
 0x2f7   : > { %1188 = vset.pattern.permute.xlu0 %v1327_v44 }
 0x33e   : > { %v431_v26 = vpop.permute.xlu1 %430 }
 0x33f   : > { %v434_v27 = vsel %vm433_vm6, %v431_v26, 0.0 }
 0x340   : > { %435 = vadd.xlane.f32.xlu0 %v434_v27  ;;  %v1331_v27 = vmov 6  }
 0x34e   : > { %v355_v11 = vpop.trf.xlu0 }
 0x34f   : > { %v374_v28 = vrot.slane %v355_v11, %v1480_v5 }
 0x351   : > { %v375_v29 = vmul.f32 %v374_v28, %v1561_v15 }
 0x353   : > { %v377_v30 = vsel %vm376_vm7, %v375_v29, 0.0 }
 0x354   : > { %378 = vadd.xlane.f32.xlu1 %v377_v30 }
 0x38e   : > { %v662_v32 = vpop.f32.mrb[0].mxu0 }
 0x38f   : > { %v664_v33 = vpop.f32.mrb[1].mxu0 }
 0x3cd   : > { %v436_v34 = vpop.xlane.xlu0 %435 }
 0x3e1   : > { %v379_v35 = vpop.xlane.xlu1 %378 }
 0x3e2   : > { %v437_v36 = vadd.f32 %v436_v34, %v379_v35 }
 0x3e4   : > { %v438_v37 = vadd.f32 %v437_v36, %v1540_v1 }
 0x3e6   : > { %669 = vperm.xlu1 %1187, %v438_v37   ;;  %v1332_v37 = vmov 7  }
 0x3ea   : > { %1189 = vset.pattern.permute.xlu1 %v1328_v53 }
 0x465   : > { %v670_v38 = vpop.permute.xlu1 %669 }
 0x466   : > { %v1580_v39 = vadd.f32 %v670_v38, %v662_v32  ;;  %v1582_v40 = vadd.f32 %v670_v38, %v664_v33 }
 0x468   : > { %v674_v5 = vadd.f32 %v1582_v40, %v1580_v39  ;;  %v678_v41 = vmul.f32 %v1580_v39, %v1580_v39  ;;  %v679_v42 = vmul.f32 %v1582_v40, %v1582_v40 }
 0x46a   : > { %675 = vadd.xlane.f32.xlu0 %v674_v5  ;;  %v680_v43 = vadd.f32 %v679_v42, %v678_v41  ;;  %v1334_v41 = vmov 8  }
 0x46e   : > { %681 = vadd.xlane.f32.xlu0 %v680_v43 }
 0x4f7   : > { %v676_v45 = vpop.xlane.xlu0 %675 }
 0x4f8   : > { %v677_v46 = vmul.f32 0.00390625, %v676_v45 }
 0x4fa   : > { %v684_v48 = vmul.f32 %v677_v46, %v677_v46 }
 0x4fb   : > { %v682_v47 = vpop.xlane.xlu0 %681 }
 0x4fc   : > { %v683_v49 = vmul.f32 0.00390625, %v682_v47 }
 0x4fe   : > { %v685_v50 = vsub.f32 %v683_v49, %v684_v48 }
 0x500   : > { %v686_v51 = vmax.f32 %v685_v50, 0.0 }
 0x502   : > { %v687_v52 = vadd.f32 1e-05, %v686_v51 }
 0x504   : > { %1202 = vrsqrt.f32 %v687_v52 }
 0x50e   : > { %v1203_v54 = vpop.eup %1202 }
 0x50f   : > { %v689_v55 = vmul.f32 %v1203_v54, %v1540_v1 }
 0x511   : > { %692 = vperm.xlu0 %1188, %v689_v55   ;;  %v697_v56 = vmul.f32 %v689_v55, %v677_v46 }
 0x513   : > { %699 = vrot.lane.b32.xlu1 %v697_v56, %s1321_s29 }
 0x515   : > { %1193 = vset.pattern.permute.xlu0 %v1334_v41 }
 0x585   : > { %v700_v57 = vpop.permute.xlu1 %699 }
 0x586   : > { %v702_v58 = vsub.f32 %v1540_v1, %v700_v57 }
 0x588   : > { %705 = vperm.xlu1 %1189, %v702_v58  }
 0x58c   : > { %728 = vrot.lane.b32.xlu1 %v1561_v15, %s1329_s26 }
 0x58d   : > { %1190 = vset.pattern.permute.xlu1 %v1330_v59 }
 0x590   : > { %724 = vperm.xlu1 %1190, %v1540_v1   ;;  %v693_v60 = vpop.permute.xlu0 %692 }
 0x591   : > { %v695_v61 = vmul.f32 %v693_v60, %v1580_v39  ;;  %v696_v62 = vmul.f32 %v693_v60, %v1582_v40 }
 0x594   : > { %1191 = vset.pattern.permute.xlu1 %v1331_v27 }
 0x607   : > { %v706_v63 = vpop.permute.xlu1 %705 }
 0x608   : > { %v708_v0 = vadd.f32 %v706_v63, %v695_v61  ;;  %v709_v3 = vadd.f32 %v706_v63, %v696_v62 }
 0x60a   : > { %v712_v4 = vmin.f32 %v708_v0, 0.0  ;;  %v713_v6 = vmin.f32 %v709_v3, 0.0  ;;  %vm710_vm8 = vcmp.gt.f32.partialorder %v708_v0, 0.0  ;;  %vm711_vm9 = vcmp.gt.f32.partialorder %v709_v3, 0.0 }
 0x60b   : > { %v729_v19 = vpop.permute.xlu1 %728 }
 0x60c   : > { %v714_v7 = vmul.f32 1.442695, %v712_v4  ;;  %v716_v8 = vmul.f32 1.442695, %v713_v6 }
 0x60e   : > { %1204 = vpow2.f32 %v714_v7 }
 0x60f   : > { %1206 = vpow2.f32 %v716_v8  ;;  %v725_v13 = vpop.permute.xlu1 %724  ;;  %v1335_v8 = vmov 9  }
 0x618   : > { %v1205_v9 = vpop.eup %1204 }
 0x619   : > { %v1207_v10 = vpop.eup %1206  ;;  %v1100_v17 = vadd.f32 -1.0, %v1205_v9 }
 0x61a   : > { %v1101_v14 = vadd.f32 -1.0, %v1207_v10 }
 0x61b   : > { %v720_v18 = vsel %vm710_vm8, %v708_v0, %v1100_v17 }
 0x61c   : > { %v721_v12 = vsel %vm711_vm9, %v709_v3, %v1101_v14 }
 0x61d   : > { %732 = vmatprep.subr.mxu1 %v721_v12 }
 0x61e   : > { %733 = vmatpush1.msra.mxu1 %v720_v18 }
 0x61f   : > { %1102 = vmatmul.mubr.msk.f32.vlgmr.msra.gmra.mrb[0].mxu1 %vm376_vm7, %v729_v19 }
 0x620   : > { %923 = vmatprep.mubr.f32.mxu1 %v1320_v2 }
 0x6f2   : > { %v798_v16 = vpop.f32.mrb[0].mxu1 }
 0x6f3   : > { %v799_v20 = vadd.f32 %v798_v16, %v725_v13  ;;  %v800_v21 = vpop.f32.mrb[1].mxu1 }
 0x6f4   : > { %v801_v22 = vadd.f32 %v800_v21, %v725_v13 }
 0x6f5   : > { %v807_v23 = vmul.f32 %v799_v20, %v799_v20 }
 0x6f6   : > { %v803_v24 = vadd.f32 %v801_v22, %v799_v20  ;;  %v808_v25 = vmul.f32 %v801_v22, %v801_v22 }
 0x6f8   : > { %804 = vadd.xlane.f32.xlu1 %v803_v24  ;;  %v809_v26 = vadd.f32 %v808_v25, %v807_v23 }
 0x6fa   : > { %810 = vadd.xlane.f32.xlu0 %v809_v26 }
 0x710   : > { %852 = vperm.xlu0 %1193, %v1540_v1  }
 0x714   : > { %1194 = vset.pattern.permute.xlu0 %v1335_v8 }
 0x785   : > { %v805_v11 = vpop.xlane.xlu1 %804 }
 0x786   : > { %v806_v28 = vmul.f32 0.00390625, %v805_v11 }
 0x787   : > { %v811_v29 = vpop.xlane.xlu0 %810 }
 0x788   : > { %v813_v30 = vmul.f32 %v806_v28, %v806_v28  ;;  %v812_v31 = vmul.f32 0.00390625, %v811_v29 }
 0x78a   : > { %v814_v32 = vsub.f32 %v812_v31, %v813_v30 }
 0x78c   : > { %v815_v2 = vmax.f32 %v814_v32, 0.0 }
 0x78e   : > { %v816_v33 = vadd.f32 1e-05, %v815_v2 }
 0x78f   : > { %v853_v58 = vpop.permute.xlu0 %852 }
 0x790   : > { %1208 = vrsqrt.f32 %v816_v33 }
 0x79a   : > { %v1209_v34 = vpop.eup %1208 }
 0x79b   : > { %v818_v35 = vmul.f32 %v1209_v34, %v1540_v1 }
 0x79d   : > { %v826_v36 = vmul.f32 %v818_v35, %v806_v28 }
 0x79f   : > { %828 = vrot.lane.b32.xlu1 %v826_v36, %s1321_s29 }
 0x7a3   : > { %821 = vperm.xlu1 %1191, %v818_v35  }
 0x7a7   : > { %1192 = vset.pattern.permute.xlu1 %v1332_v37 }
 0x811   : > { %v829_v38 = vpop.permute.xlu1 %828 }
 0x812   : > { %v831_v5 = vsub.f32 %v1540_v1, %v829_v38 }
 0x814   : > { %834 = vperm.xlu1 %1192, %v831_v5  }
 0x818   : > { %855 = vrot.lane.b32.xlu1 %v1561_v15, %s1333_s10 }
 0x822   : > { %v822_v42 = vpop.permute.xlu1 %821 }
 0x823   : > { %v824_v43 = vmul.f32 %v822_v42, %v799_v20  ;;  %v825_v44 = vmul.f32 %v822_v42, %v801_v22  ;;  %v1336_v20 = vmov 10  }
 0x893   : > { %v835_v45 = vpop.permute.xlu1 %834 }
 0x894   : > { %v837_v46 = vadd.f32 %v835_v45, %v824_v43  ;;  %v838_v47 = vadd.f32 %v835_v45, %v825_v44 }
 0x896   : > { %v841_v48 = vmin.f32 %v837_v46, 0.0  ;;  %v842_v49 = vmin.f32 %v838_v47, 0.0  ;;  %vm839_vm10 = vcmp.gt.f32.partialorder %v837_v46, 0.0  ;;  %vm840_vm11 = vcmp.gt.f32.partialorder %v838_v47, 0.0 }
 0x897   : > { %v856_v57 = vpop.permute.xlu1 %855 }
 0x898   : > { %v843_v50 = vmul.f32 1.442695, %v841_v48  ;;  %v845_v51 = vmul.f32 1.442695, %v842_v49 }
 0x89a   : > { %1210 = vpow2.f32 %v843_v50 }
 0x89b   : > { %1212 = vpow2.f32 %v845_v51 }
 0x8a4   : > { %v1211_v52 = vpop.eup %1210 }
 0x8a5   : > { %v1213_v53 = vpop.eup %1212  ;;  %v1103_v54 = vadd.f32 -1.0, %v1211_v52 }
 0x8a6   : > { %v1104_v15 = vadd.f32 -1.0, %v1213_v53 }
 0x8a7   : > { %v849_v55 = vsel %vm839_vm10, %v837_v46, %v1103_v54 }
 0x8a8   : > { %v850_v56 = vsel %vm840_vm11, %v838_v47, %v1104_v15 }
 0x8a9   : > { %859 = vmatprep.subr.mxu1 %v850_v56 }
 0x8aa   : > { %860 = vmatpush1.msra.mxu1 %v849_v55 }
 0x8ab   : > { %1105 = vmatmul.mubr.msk.f32.vlgmr.msra.gmra.mrb[2].mxu1 %vm376_vm7, %v856_v57 }
 0x97e   : > { %v925_v59 = vpop.f32.mrb[2].mxu1 }
 0x97f   : > { %v926_v60 = vadd.f32 %v925_v59, %v853_v58  ;;  %v927_v61 = vpop.f32.mrb[3].mxu1 }
 0x980   : > { %v928_v62 = vadd.f32 %v927_v61, %v853_v58 }
 0x981   : > { %v930_v63 = vadd.f32 %v926_v60, %v1580_v39 }
 0x982   : > { %v931_v0 = vadd.f32 %v928_v62, %v1582_v40 }
 0x983   : > { %v936_v4 = vmul.f32 %v930_v63, %v930_v63 }
 0x984   : > { %v932_v3 = vadd.f32 %v931_v0, %v930_v63  ;;  %v937_v6 = vmul.f32 %v931_v0, %v931_v0 }
 0x986   : > { %933 = vadd.xlane.f32.xlu1 %v932_v3  ;;  %v938_v7 = vadd.f32 %v937_v6, %v936_v4 }
 0x98a   : > { %939 = vadd.xlane.f32.xlu1 %v938_v7 }
 0xa13   : > { %v934_v9 = vpop.xlane.xlu1 %933 }
 0xa14   : > { %v935_v10 = vmul.f32 0.00390625, %v934_v9 }
 0xa16   : > { %v942_v14 = vmul.f32 %v935_v10, %v935_v10 }
 0xa17   : > { %v940_v17 = vpop.xlane.xlu1 %939 }
 0xa18   : > { %v941_v18 = vmul.f32 0.00390625, %v940_v17 }
 0xa1a   : > { %v943_v12 = vsub.f32 %v941_v18, %v942_v14 }
 0xa1c   : > { %v944_v19 = vmax.f32 %v943_v12, 0.0 }
 0xa1e   : > { %v945_v13 = vadd.f32 1e-05, %v944_v19 }
 0xa20   : > { %1214 = vrsqrt.f32 %v945_v13 }
 0xa2a   : > { %v1215_v39 = vpop.eup %1214 }
 0xa2b   : > { %v947_v40 = vmul.f32 %v1215_v39, %v1540_v1 }
 0xa2d   : > { %950 = vperm.xlu0 %1194, %v947_v40   ;;  %v955_v16 = vmul.f32 %v947_v40, %v935_v10 }
 0xa2f   : > { %957 = vrot.lane.b32.xlu1 %v955_v16, %s1321_s29  ;;  %s1615_s29 = scalar_lea.hbm %s1663_s4, %s1115_s12 }
 0xa31   : > { %1195 = vset.pattern.permute.xlu0 %v1336_v20 }
 0xaa1   : > { %v958_v21 = vpop.permute.xlu1 %957 }
 0xaa2   : > { %v960_v22 = vsub.f32 %v1540_v1, %v958_v21 }
 0xaa4   : > { %963 = vperm.xlu0 %1195, %v960_v22  }
 0xaac   : > { %v951_v23 = vpop.permute.xlu0 %950 }
 0xaad   : > { %v953_v24 = vmul.f32 %v951_v23, %v930_v63  ;;  %v954_v25 = vmul.f32 %v951_v23, %v931_v0 }
 0xb23   : > { %v964_v26 = vpop.permute.xlu0 %963 }
 0xb24   : > { %v966_v27 = vadd.f32 %v964_v26, %v953_v24  ;;  %v967_v11 = vadd.f32 %v964_v26, %v954_v25 }
 0xb26   : > { %v970_v28 = vmin.f32 %v966_v27, 0.0  ;;  %v971_v29 = vmin.f32 %v967_v11, 0.0  ;;  %vm968_vm12 = vcmp.gt.f32.partialorder %v966_v27, 0.0  ;;  %vm969_vm13 = vcmp.gt.f32.partialorder %v967_v11, 0.0 }
 0xb28   : > { %v972_v30 = vmul.f32 1.442695, %v970_v28  ;;  %v974_v31 = vmul.f32 1.442695, %v971_v29 }
 0xb2a   : > { %1216 = vpow2.f32 %v972_v30 }
 0xb2b   : > { %1218 = vpow2.f32 %v974_v31 }
 0xb34   : > { %v1217_v32 = vpop.eup %1216 }
 0xb35   : > { %v1219_v1 = vpop.eup %1218  ;;  %v1106_v2 = vadd.f32 -1.0, %v1217_v32 }
 0xb36   : > { %v1107_v33 = vadd.f32 -1.0, %v1219_v1 }
 0xb37   : > { %v978_v34 = vsel %vm968_vm12, %v966_v27, %v1106_v2 }
 0xb38   : > { %v979_v35 = vsel %vm969_vm13, %v967_v11, %v1107_v33  ;;  %980 = vst [vmem:[%s228_s20] sm:$0xff] %v978_v34 }
 0xb39   : > { %981 = vst [vmem:[%s228_s20 + $0x8] sm:$0xff] %v979_v35 }
 0xb3a   : > { %1263 = shalt.err (!%p1260_p5)
}
 0xb3b   : > { %s1264_s7 = scalar_lea.hbm %s1615_s29, 256  ;;  %s1268_s8 = scalar_lea.hbm %s1663_s4, 512 }
 0xb3c   : > { %p1265_p8 = scmp.ne.s32.totalorder %s1615_s29, %s1264_s7  ;;  %p1269_p1 = scmp.lt.u32.totalorder %s1615_s29, %s1663_s4 }
 0xb3d   : > { %p1270_p3 = scmp.lt.u32.totalorder %s1268_s8, %s1264_s7  ;;  %p1272_p6 = scmp.lt.u32.totalorder %s1264_s7, %s1615_s29 }
 0xb3e   : > { %p1266_p9 = pnand %p1265_p8, %p1672_p12 }
 0xb3f   : > { %p1271_p11 = por %p1270_p3, %p1269_p1 }
 0xb40   : > { %p1267_p0 = pneg %p1266_p9 }
 0xb41   : > { %p1273_p13 = por %p1272_p6, %p1271_p11 }
 0xb43   : > { %p1274_p7 = pnand %p1273_p13, %p1267_p0 }
 0xb45   : > { %1277 = shalt.err (!%p1274_p7)
}
 0xb46   : > { %1124 = dma.vmem_to_hbm [thread:$0]  (%p1672_p12), %s1617_s22, 256, %s1615_s29, %s983_s19  }
 0xb47 PF: > { %s1009_s11 = sand.u32 1, %s1304_s15   ;;  %p1673_p10 = scmp.ne.s32.totalorder %s1668_s28, 0 }
 0xb48   : > { %p1674_p2 = scmp.ge.s32.totalorder %s1316_s18, 2  ;;  %s1010_s12 = scalar_lea.sflag [#allocation4], %s1009_s11 }
 0xb4a   : > { %p1131_p4 = pnand %p1674_p2, %p1673_p10 }
 0xb4c   : > { %1299 = dma.done.wait (!%p1131_p4), %s1010_s12, 256  }
 0xb4d   : > { %1301 = vsyncadd (!%p1131_p4), %s1010_s12, 4294967040  ;;  %p17_p5 = scmp.ge.s32.totalorder %s1388_s21, 4   ;;  %s1675_s15 = smov %s1308_s16 }
 0xb4e   : > { %s1676_s16 = smov %s1312_s17  ;;  %s1677_s17 = smov %s1400_s24 }
 0xb4f   : > { %s1678_s18 = smov %s1388_s21  ;;  %19 = sbr.rel (!%p17_p5) target bundleno = 5 (0x5), region = 84 }
 0xb56   :  { %1015 = vsyncpa [#allocation3], 1 }
 0xb57   :  { %1017 = vsyncpa [#allocation3 + $0x1], 1 }
 0xb58   :  { %1018 = vsyncpa [#allocation4], 1 }
 0xb59   :  { %1020 = vsyncpa [#allocation4 + $0x1], 1 }

</bundles_post_ra>
